<compile_context>
chip_gen: v7x
topology: tpu7x:2x2x1
jax: 0.10.0
libtpu: 0.0.40
codegen_flags: <defaults>
</compile_context>

<pallas_src>
from functools import lru_cache, partial

import numpy as np
import jax
import jax.numpy as jnp
from jax.experimental import pallas as pl
from jax.experimental.pallas import tpu as pltpu


def _custom_layer_kernel(x_ref, pvec_ref, g_ref, scal_ref, out_ref):
    # x_ref:    (TILE_B, 6*in_dim) input rows, x duplicated once (VMEM)
    # pvec_ref: (1, 6*in_dim)      per-column slope params (VMEM, resident)
    # g_ref:    (6*in_dim, N_pad)  0/1 one-hot expansion matrix, bf16 (resident)
    # scal_ref: (3,)               [bias[0], params[6], bias[1]] (SMEM scalars)
    # out_ref:  (TILE_B, N_pad)
    b0 = scal_ref[0]
    p_last = scal_ref[1]
    b1 = scal_ref[2]

    # All distinct per-row values (each output column copies exactly one of
    # these): 6*in_dim tanh per row instead of 6*in_dim^2.
    t = jnp.tanh(x_ref[...] * pvec_ref[...] + b0) * p_last + b1      # f32

    # Exact-ish two-term bf16 split of t (residual <= 2^-16 * |t|); G is 0/1 so
    # two native bf16 MXU passes reproduce the f32 gather well inside 1e-5.
    t_hi = t.astype(jnp.bfloat16)
    t_lo = (t - t_hi.astype(jnp.float32)).astype(jnp.bfloat16)
    g = g_ref[...]
    out_ref[...] = (
        jnp.dot(t_hi, g, preferred_element_type=jnp.float32)
        + jnp.dot(t_lo, g, preferred_element_type=jnp.float32)
    )


def _pick_tile_b(batch, n_pad):
    """Row-tile size: as large as VMEM comfortably allows (double-buffered f32
    out tile <= ~12 MiB, cap 2048), while keeping >=4 grid steps (2 per v7x
    TensorCore) when tiles stay >=128 rows, else >=2 steps."""
    if batch <= 16:
        return batch                                   # single full-array block
    budget = 12 * 1024 * 1024
    vmem_cap = budget // (2 * 4 * max(n_pad, 1))       # 4 B/elem, x2 double-buffer
    cap = max(8, min(2048, (vmem_cap // 8) * 8))
    per4 = -(-batch // 4)
    per2 = -(-batch // 2)
    target = per4 if per4 >= 128 else per2
    target = -(-target // 8) * 8                       # sublane multiple
    return max(8, min(cap, target))


def _gather_pattern(in_dim):
    """Which column of t (the 6*in_dim tanh values) feeds each output column.
    t columns [0, 3*in_dim) use even slopes p0/p2/p4, [3*in_dim, 6*in_dim) use
    odd slopes p1/p3/p5."""
    cols = []
    for i in range(in_dim):
        for j in range(in_dim):
            cols += [i, 3 * in_dim + j,
                     in_dim + i, 4 * in_dim + j,
                     2 * in_dim + i, 5 * in_dim + j]
    return cols


@lru_cache(maxsize=None)
def _gather_matrix_np(in_dim):
    """0/1 one-hot expansion matrix (6*in_dim, N padded to multiple of 128)."""
    n = 6 * in_dim * in_dim
    n_pad = ((n + 127) // 128) * 128
    cols = _gather_pattern(in_dim)
    g = np.zeros((6 * in_dim, n_pad), dtype=np.float32)
    g[np.asarray(cols), np.arange(n)] = 1.0
    return g


@partial(jax.jit, static_argnames=("in_dim", "min_pallas_elems"))
def custom_layer_forward(x, params, bias, in_dim, min_pallas_elems=1 << 14):
    """Pallas implementation of customLayer.forward.

    x:      (B, C) float32, C >= 3*in_dim
    params: (7,)   float32
    bias:   (2,)   float32
    returns (B, 6*in_dim*in_dim) float32
    """
    B, C = x.shape
    assert C >= 3 * in_dim, f"x has {C} features, need at least {3 * in_dim}"
    n = 6 * in_dim * in_dim
    n_pad = ((n + 127) // 128) * 128

    x3 = x[:, : 3 * in_dim].astype(jnp.float32)      # no-op slice when C == 3*in_dim
    params = params.astype(jnp.float32)
    bias = bias.astype(jnp.float32)

    # x duplicated: columns [0,3*in_dim) paired with even slopes, [3*in_dim,
    # 6*in_dim) with odd slopes.
    x6 = jnp.concatenate([x3, x3], axis=1)                       # (B, 6*in_dim)
    slope_order = jnp.asarray([0, 2, 4, 1, 3, 5], dtype=jnp.int32)
    pvec = jnp.repeat(params[slope_order], in_dim)[None, :]      # (1, 6*in_dim)

    if B * n < min_pallas_elems:
        # Tiny problems: kernel launch + grid-step overhead dwarfs the work.
        t = jnp.tanh(x6 * pvec + bias[0]) * params[6] + bias[1]
        cols = jnp.asarray(_gather_pattern(in_dim), dtype=jnp.int32)
        return jnp.take(t, cols, axis=1)

    g = jnp.asarray(_gather_matrix_np(in_dim), dtype=jnp.bfloat16)   # (6*in_dim, n_pad), 0/1
    scal = jnp.stack([bias[0], params[6], bias[1]])                  # (3,) SMEM scalars

    tile_b = _pick_tile_b(B, n_pad)
    grid = (pl.cdiv(B, tile_b),)

    out = pl.pallas_call(
        _custom_layer_kernel,
        out_shape=jax.ShapeDtypeStruct((B, n_pad), jnp.float32),
        grid=grid,
        in_specs=[
            pl.BlockSpec((tile_b, 6 * in_dim), lambda i: (i, 0)),
            pl.BlockSpec((1, 6 * in_dim), lambda i: (0, 0)),      # resident slopes
            pl.BlockSpec((6 * in_dim, n_pad), lambda i: (0, 0)),  # resident one-hot G
            pl.BlockSpec(memory_space=pltpu.MemorySpace.SMEM),    # 3 scalars
        ],
        out_specs=pl.BlockSpec((tile_b, n_pad), lambda i: (i, 0)),
        compiler_params=pltpu.CompilerParams(
            dimension_semantics=("parallel",),                    # megacore on v7x
        ),
    )(x6, pvec, g, scal)
    # TODO(synk): for very large in_dim the (6*in_dim, 6*in_dim^2) one-hot
    # matrix should also be tiled along N; not needed at module-typical sizes.
    if n_pad != n:
        out = out[:, :n]
    return out


def _reference_forward(x, params, bias, in_dim):
    # Direct numpy transcription of the PyTorch forward.
    accs = []
    for i in range(in_dim):
        for j in range(in_dim):
            info = [
                x[:, i], x[:, j],
                x[:, in_dim + i], x[:, in_dim + j],
                x[:, 2 * in_dim + i], x[:, 2 * in_dim + j],
            ]
            for k in range(len(info)):
                accs.append(np.tanh(info[k] * params[k] + bias[0]) * params[6] + bias[1])
    return np.stack(accs, axis=0).T  # vstack + permute(1, 0)


if __name__ == "__main__":
    key = jax.random.PRNGKey(0)
    k1, k2 = jax.random.split(key)

    # Deterministic parameters, per the module __init__.
    params = 0.5 * jnp.ones((7,), dtype=jnp.float32)
    bias = jnp.zeros((2,), dtype=jnp.float32)

    # Main case: 256-row tiles -> grid of 4 (2 steps per v7x core, partial edge
    # block) and a lane-dense output (N = 6*8*8 = 384 = 3*128, no padding).
    in_dim = 8
    B = 1000
    x = jax.random.normal(k1, (B, 3 * in_dim), dtype=jnp.float32)
    out = jax.block_until_ready(custom_layer_forward(x, params, bias, in_dim=in_dim))
    assert out.shape == (B, 6 * in_dim * in_dim), out.shape
    ref = _reference_forward(np.asarray(x), np.asarray(params), np.asarray(bias), in_dim)
    np.testing.assert_allclose(np.asarray(out), ref, rtol=1e-5, atol=1e-5)

    # Small case (original module test sizes): N = 96 -> padded to 128 output
    # columns (exercises the padding/slice path); force the Pallas path.
    in_dim2, B2 = 4, 8
    x2 = jax.random.normal(k2, (B2, 3 * in_dim2), dtype=jnp.float32)
    out2 = jax.block_until_ready(
        custom_layer_forward(x2, params, bias, in_dim=in_dim2, min_pallas_elems=0)
    )
    assert out2.shape == (B2, 6 * in_dim2 * in_dim2), out2.shape
    ref2 = _reference_forward(np.asarray(x2), np.asarray(params), np.asarray(bias), in_dim2)
    np.testing.assert_allclose(np.asarray(out2), ref2, rtol=1e-5, atol=1e-5)

    print("KERNEL_OK")
</pallas_src>

<mosaic_0001>
module attributes {stable_mosaic.version = 11 : i64} {
  func.func @_custom_layer_kernel(%arg0: i32, %arg1: memref<256x48xf32, #tpu.memory_space<vmem>>, %arg2: memref<1x48xf32, #tpu.memory_space<vmem>>, %arg3: memref<48x384xbf16, #tpu.memory_space<vmem>>, %arg4: memref<3xf32, #tpu.memory_space<smem>>, %arg5: memref<256x384xf32, #tpu.memory_space<vmem>>) attributes {dimension_semantics = [#tpu.dimension_semantics<parallel>], iteration_bounds = array<i64: 4>, scalar_prefetch = 0 : i64, scratch_operands = 0 : i64, tpu.core_type = #tpu.core_type<tc>, window_params = [{transform_indices = @transform_0, window_bounds = array<i64: 256, 48>}, {pipeline_mode = #tpu.pipeline_mode<synchronous>, transform_indices = @transform_1, window_bounds = array<i64: 1, 48>}, {pipeline_mode = #tpu.pipeline_mode<synchronous>, transform_indices = @transform_2, window_bounds = array<i64: 48, 384>}, {transform_indices = @transform_3, window_bounds = array<i64: 3>}, {transform_indices = @transform_4, window_bounds = array<i64: 256, 384>}]} {
    %c0 = arith.constant 0 : index
    %0 = memref.load %arg4[%c0] : memref<3xf32, #tpu.memory_space<smem>>
    %c1 = arith.constant 1 : index
    %1 = memref.load %arg4[%c1] : memref<3xf32, #tpu.memory_space<smem>>
    %c2 = arith.constant 2 : index
    %2 = memref.load %arg4[%c2] : memref<3xf32, #tpu.memory_space<smem>>
    %c0_0 = arith.constant 0 : index
    %c0_1 = arith.constant 0 : index
    %3 = vector.load %arg1[%c0_0, %c0_1] : memref<256x48xf32, #tpu.memory_space<vmem>>, vector<256x48xf32>
    %c0_2 = arith.constant 0 : index
    %c0_3 = arith.constant 0 : index
    %4 = vector.load %arg2[%c0_2, %c0_3] : memref<1x48xf32, #tpu.memory_space<vmem>>, vector<1x48xf32>
    %5 = vector.broadcast %4 : vector<1x48xf32> to vector<256x48xf32>
    %6 = arith.mulf %3, %5 : vector<256x48xf32>
    %7 = vector.broadcast %0 : f32 to vector<256x48xf32>
    %8 = arith.addf %6, %7 : vector<256x48xf32>
    %9 = math.tanh %8 : vector<256x48xf32>
    %10 = vector.broadcast %1 : f32 to vector<256x48xf32>
    %11 = arith.mulf %9, %10 : vector<256x48xf32>
    %12 = vector.broadcast %2 : f32 to vector<256x48xf32>
    %13 = arith.addf %11, %12 : vector<256x48xf32>
    %14 = arith.truncf %13 : vector<256x48xf32> to vector<256x48xbf16>
    %15 = arith.extf %14 : vector<256x48xbf16> to vector<256x48xf32>
    %16 = arith.subf %13, %15 : vector<256x48xf32>
    %17 = arith.truncf %16 : vector<256x48xf32> to vector<256x48xbf16>
    %c0_4 = arith.constant 0 : index
    %c0_5 = arith.constant 0 : index
    %18 = vector.load %arg3[%c0_4, %c0_5] : memref<48x384xbf16, #tpu.memory_space<vmem>>, vector<48x384xbf16>
    %cst = arith.constant dense<0.000000e+00> : vector<256x384xf32>
    %19 = tpu.matmul %14, %18, %cst {dimension_numbers = #tpu.dot_dimension_numbers<[1], [0], [0], [1], [0, 0, 1, 1], [], []>} : vector<256x48xbf16>, vector<48x384xbf16>, vector<256x384xf32> -> vector<256x384xf32>
    %cst_6 = arith.constant dense<0.000000e+00> : vector<256x384xf32>
    %20 = tpu.matmul %17, %18, %cst_6 {dimension_numbers = #tpu.dot_dimension_numbers<[1], [0], [0], [1], [0, 0, 1, 1], [], []>} : vector<256x48xbf16>, vector<48x384xbf16>, vector<256x384xf32> -> vector<256x384xf32>
    %21 = arith.addf %19, %20 : vector<256x384xf32>
    %c0_7 = arith.constant 0 : index
    %c0_8 = arith.constant 0 : index
    %22 = vector.load %arg5[%c0_7, %c0_8] : memref<256x384xf32, #tpu.memory_space<vmem>>, vector<256x384xf32>
    tpu.vector_store %arg5[%c0_7, %c0_8], %21 {strides = array<i32>} : memref<256x384xf32, #tpu.memory_space<vmem>>, vector<256x384xf32>,
    return
  }
  func.func @transform_0(%arg0: i32) -> (i32, i32) {
    %c0_i32 = arith.constant 0 : i32
    %c0_i32_0 = arith.constant 0 : i32
    return %arg0, %c0_i32 : i32, i32
  }
  func.func @transform_1(%arg0: i32) -> (i32, i32) {
    %c0_i32 = arith.constant 0 : i32
    %c0_i32_0 = arith.constant 0 : i32
    %c0_i32_1 = arith.constant 0 : i32
    return %c0_i32, %c0_i32_0 : i32, i32
  }
  func.func @transform_2(%arg0: i32) -> (i32, i32) {
    %c0_i32 = arith.constant 0 : i32
    %c0_i32_0 = arith.constant 0 : i32
    %c0_i32_1 = arith.constant 0 : i32
    return %c0_i32, %c0_i32_0 : i32, i32
  }
  func.func @transform_3(%arg0: i32) -> i32 {
    %c0_i32 = arith.constant 0 : i32
    %c0_i32_0 = arith.constant 0 : i32
    return %c0_i32 : i32
  }
  func.func @transform_4(%arg0: i32) -> (i32, i32) {
    %c0_i32 = arith.constant 0 : i32
    %c0_i32_0 = arith.constant 0 : i32
    return %arg0, %c0_i32 : i32, i32
  }
}

</mosaic_0001>

<bundles_post_ra>
// kernel: custom_layer_forward.1
= control target key start
LH: loop header
LB: loop body
LE: loop exit
PB: predicated region body
PF: predicated region fallthrough
CT: control target
= control target key end

     0   :  { %9 = vsyncpa [#allocation4], 0  ;;  %s2989_s0 = inlined_call_operand.vmem [shape: f32[1000,48], index: 0, kind: input, shape index: {}]   ;;  %s2990_s1 = inlined_call_operand.vmem [shape: f32[1,48], index: 1, kind: input, shape index: {}]   ;;  %s2991_s2 = inlined_call_operand.vmem [shape: bf16[48,384], index: 2, kind: input, shape index: {}]   ;;  %s2992_s3 = inlined_call_operand.vmem [shape: f32[3], index: 3, kind: input, shape index: {}]   ;;  %s2993_s4 = inlined_call_operand.hbm [shape: f32[1000,384], index: 4, kind: output, shape index: {}]  }
   0x1   :  { %10 = vsyncpa [#allocation3], 0 }
   0x2   :  { %12 = vsyncpa [#allocation3 + $0x1], 0  ;;  %s2149_s15 = smov 0   ;;  %s2151_s16 = smov 0  }
   0x3   :  { %s2153_s17 = smov 0   ;;  %s2155_s18 = smov 0  }
   0x4 LB: > { %s2170_s19 = sadd.s32 4294967295, %s2117_s18   ;;  %s1597_s20 = sadd.s32 4294967294, %s2117_s18   ;;  %s2117_s18 = sphi %s2155_s18, %s3000_s18   ;;  %s2113_s17 = sphi %s2153_s17, %s2999_s17   ;;  %s2109_s16 = sphi %s2151_s16, %s2998_s16   ;;  %s2105_s15 = sphi %s2149_s15, %s2997_s15  }
   0x5   : > { %s2174_s21 = sadd.s32 1, %s2117_s18   ;;  %s114_s22 = sadd.s32 1, %s2113_s17 }
   0x6   : > { %s111_s23 = ssub.s32 %s2117_s18, %s2174_s21  ;;  %p124_p0 = scmp.ne.s32.totalorder %s2113_s17, %s2109_s16 }
   0x7   : > { %p112_p1 = scmp.eq.s32.totalorder %s111_s23, 0  ;;  %p125_p2 = scmp.eq.s32.totalorder %s2170_s19, 3 }
   0x8   : > { %p130_p3 = scmp.ne.s32.totalorder %s2109_s16, %s2105_s15  ;;  %p131_p4 = scmp.eq.s32.totalorder %s1597_s20, 3 }
   0x9   : > { %s2185_s24 = scalar_select %p112_p1, %s2113_s17, %s114_s22  }
   0xa   : > { %p2187_p5 = por %p125_p2, %p124_p0  ;;  %p2191_p6 = por %p131_p4, %p130_p3 }
   0xb   : > { %p1598_p7 = scmp.ge.s32.totalorder %s2117_s18, 1  ;;  %p138_p8 = scmp.lt.s32.totalorder %s2117_s18, 5 }
   0xc   : > { %p1921_p9 = scmp.eq.s32.totalorder %s2170_s19, 0  ;;  %s157_s30 = sshll.u32 %s2992_s3, 4  ;;  %s158_s30 = int_to_ptr.vmem [resolvable:$true] %s157_s30 }
   0xd   : > { %p2198_p10 = pnand %p1598_p7, %p138_p8  ;;  %s2036_s5 = scalar_lea.vmem %s158_s30, 16 }
   0xe   : > { %p2037_p13 = scmp.ne.s32.totalorder %s158_s30, %s2036_s5  ;;  %p2044_p3 = scmp.lt.s32.totalorder %s158_s30, %s158_s30 }
   0xf   : > { %p1913_p11 = pneg %p2198_p10  ;;  %p2045_p4 = scmp.lt.s32.totalorder %s2036_s5, %s2036_s5 }
  0x11   : > { %p1914_p12 = pnand %p1921_p9, %p1913_p11  ;;  %p2046_p7 = por %p2045_p4, %p2044_p3 }
  0x13   : > { %p2038_p0 = pneg %p1914_p12 }
  0x15   : > { %p2039_p1 = pnand %p2038_p0, %p2037_p13 }
  0x17   : > { %p2040_p2 = pneg %p2039_p1 }
  0x19   : > { %p2047_p8 = pnand %p2046_p7, %p2040_p2 }
  0x1b   : > { %2050 = shalt.err (!%p2047_p8)
}
  0x1c   : > { %s2119_s6 = smov [#allocation2]   ;;  %187 = sbr.rel (%p2198_p10) target bundleno = 505 (0x1f9), region = 36 }
  0x1d   : > { %1916 = dma.vmem_to_smem (!%p1914_p12), %s158_s30, 16, %s2119_s6, [#allocation4]  }
  0x23   : > { %2096 = dma.done.wait (%p1921_p9), [#allocation4], 16  }
  0x24   : > { %2098 = vsyncadd (%p1921_p9), [#allocation4], 4294967280 }
  0x25   : > { %193 = sfence }
  0x26   : > { %v1960_v0 = vld [vmem:[%s2991_s2 + $0x4] ss:$12 sps:$4 sm:$0xff]   ;;  %s2219_s9 = sshll.u32 %s2170_s19, 5  ;;  %v2224_v1 = vld [vmem:[%s2991_s2] ss:$12 sps:$4 sm:$0xff]   ;;  %v2120_v2 = vmov 0  }
  0x27   : > { %681 = vmatprep.mubr.bf16.mxu0 %v2120_v2  ;;  %761 = vmatprep.mubr.bf16.mxu1 %v2120_v2  ;;  %p223_p9 = scmp.lt.s32.totalorder %s2219_s9, 124  ;;  %v2232_v3 = vld [vmem:[%s2991_s2 + $0x1c] ss:$12 sps:$4 sm:$0xff]   ;;  %v2239_v4 = vld [vmem:[%s2991_s2 + $0x18] ss:$12 sps:$4 sm:$0xff]   ;;  %s239_s28 = sld [smem:[#allocation2]] }
  0x28   : > { %649 = vmatprep.subr.bf16.mxu0 %v1960_v0  ;;  %1804 = vmatprep.subr.bf16.mxu1 %v1960_v0  ;;  %v2247_v5 = vld [vmem:[%s2991_s2 + $0x34] ss:$12 sps:$4 sm:$0xff]   ;;  %v2252_v6 = vld [vmem:[%s2991_s2 + $0x30] ss:$12 sps:$4 sm:$0xff]   ;;  %s2299_s14 = sld [smem:[#allocation2 + $0x1]]  ;;  %s2301_s20 = sld [smem:[#allocation2 + $0x2]] }
  0x29   : > { %650 = vmatpush1.bf16.msra.mxu0 %v2224_v1  ;;  %1807 = vmatpush1.bf16.msra.mxu1 %v2224_v1  ;;  %s224_s22 = scalar_select %p223_p9, %s2219_s9, 124  ;;  %v2257_v7 = vld [vmem:[%s2990_s1] ss:$0 sm:$0xff]  ;;  %v2267_v8 = vld [vmem:[%s2991_s2 + $0x8] ss:$12 sps:$4 sm:$0xff]   ;;  %vm600_vm0 = vcmask 392192  }
  0x2a   : > { %651 = vmatprep.subr.bf16.mxu0 %v2232_v3  ;;  %1805 = vmatprep.subr.bf16.mxu1 %v2232_v3  ;;  %s215_s29 = sand.u32 1, %s2109_s16   ;;  %s1510_s7 = ssub.s32 (%p2187_p5), 125, %s2219_s9 }
  0x2b   : > { %s1604_s5 = sshll.u32 %s224_s22, 3  ;;  %s1906_s30 = smul.u32 768, %s215_s29 }
  0x2c   : > { %s2262_s11 = scalar_lea.vmem %s2989_s0, %s1604_s5  ;;  %s2928_s6 = scalar_lea.sflag [#allocation3], %s215_s29 }
  0x2d   : > { %652 = vmatpush1.bf16.msra.mxu0 %v2239_v4  ;;  %1808 = vmatpush1.bf16.msra.mxu1 %v2239_v4  ;;  %v242_v9 = vld [vmem:[%s2262_s11] sm:$0xff]  ;;  %v243_v10 = vld [vmem:[%s2262_s11 + $0x8] sm:$0xff]  ;;  %v244_v16 = vld [vmem:[%s2262_s11 + $0x10] sm:$0xff]  ;;  %v2286_v22 = vstv %s239_s28  ;;  %s2796_s5 = scalar_lea.vmem [#allocation5], %s1906_s30  ;;  %p1511_p10 = scmp.lt.s32.totalorder (%p2187_p5), %s1510_s7, 32 }
  0x2e   : > { %v258_v11 = vld [vmem:[%s2262_s11 + $0x80] sm:$0xff]  ;;  %653 = vmatprep.subr.bf16.mxu0 %v2247_v5  ;;  %1806 = vmatprep.subr.bf16.mxu1 %v2247_v5  ;;  %v281_v12 = vmul.f32 %v2257_v7, %v242_v9  ;;  %v282_v13 = vmul.f32 %v2257_v7, %v243_v10  ;;  %v259_v14 = vld [vmem:[%s2262_s11 + $0x88] sm:$0xff]  ;;  %v245_v17 = vld [vmem:[%s2262_s11 + $0x18] sm:$0xff]  ;;  %v283_v19 = vmul.f32 %v2257_v7, %v244_v16  ;;  %v2335_v62 = vstv %s2299_s14 }
  0x2f   : > { %v297_v15 = vmul.f32 %v2257_v7, %v258_v11  ;;  %v298_v18 = vmul.f32 %v2257_v7, %v259_v14  ;;  %v260_v20 = vld [vmem:[%s2262_s11 + $0x90] sm:$0xff]  ;;  %v261_v21 = vld [vmem:[%s2262_s11 + $0x98] sm:$0xff]  ;;  %v284_v23 = vmul.f32 %v2257_v7, %v245_v17  ;;  %v246_v26 = vld [vmem:[%s2262_s11 + $0x20] sm:$0xff]  ;;  %v2338_v63 = vstv %s2301_s20 }
  0x30   : > { %v299_v24 = vmul.f32 %v2257_v7, %v260_v20  ;;  %v300_v25 = vmul.f32 %v2257_v7, %v261_v21  ;;  %v314_v27 = vadd.f32 %v2286_v22, %v281_v12  ;;  %v315_v28 = vadd.f32 %v2286_v22, %v282_v13  ;;  %v247_v30 = vld [vmem:[%s2262_s11 + $0x28] sm:$0xff]  ;;  %v262_v31 = vld [vmem:[%s2262_s11 + $0xa0] sm:$0xff]  ;;  %v248_v36 = vld [vmem:[%s2262_s11 + $0x30] sm:$0xff] }
  0x31   : > { %654 = vmatpush1.bf16.msra.mxu0 %v2252_v6  ;;  %1809 = vmatpush1.bf16.msra.mxu1 %v2252_v6  ;;  %v330_v29 = vadd.f32 %v2286_v22, %v297_v15  ;;  %v331_v32 = vadd.f32 %v2286_v22, %v298_v18  ;;  %v316_v33 = vadd.f32 %v2286_v22, %v283_v19  ;;  %v263_v35 = vld [vmem:[%s2262_s11 + $0xa8] sm:$0xff]  ;;  %v249_v40 = vld [vmem:[%s2262_s11 + $0x38] sm:$0xff]  ;;  %v264_v41 = vld [vmem:[%s2262_s11 + $0xb0] sm:$0xff] }
  0x32   : > { %1051 = vmatprep.subr.bf16.mxu0 %v1960_v0  ;;  %1728 = vmatprep.subr.bf16.mxu1 %v2267_v8  ;;  %1972 = vtanh.f32 %v314_v27  ;;  %v285_v34 = vmul.f32 %v2257_v7, %v246_v26  ;;  %v317_v37 = vadd.f32 %v2286_v22, %v284_v23  ;;  %v286_v38 = vmul.f32 %v2257_v7, %v247_v30  ;;  %v265_v42 = vld [vmem:[%s2262_s11 + $0xb8] sm:$0xff]  ;;  %v250_v45 = vld [vmem:[%s2262_s11 + $0x40] sm:$0xff]  ;;  %v251_v46 = vld [vmem:[%s2262_s11 + $0x48] sm:$0xff] }
  0x33   : > { %1974 = vtanh.f32 %v315_v28  ;;  %v301_v39 = vmul.f32 %v2257_v7, %v262_v31  ;;  %v332_v43 = vadd.f32 %v2286_v22, %v299_v24  ;;  %v333_v44 = vadd.f32 %v2286_v22, %v300_v25  ;;  %v266_v47 = vld [vmem:[%s2262_s11 + $0xc0] sm:$0xff]  ;;  %v267_v51 = vld [vmem:[%s2262_s11 + $0xc8] sm:$0xff]  ;;  %v252_v58 = vld [vmem:[%s2262_s11 + $0x50] sm:$0xff] }
  0x34   : > { %1976 = vtanh.f32 %v330_v29  ;;  %v318_v48 = vadd.f32 %v2286_v22, %v285_v34  ;;  %v302_v49 = vmul.f32 %v2257_v7, %v263_v35  ;;  %v287_v50 = vmul.f32 %v2257_v7, %v248_v36  ;;  %v253_v11 = vld [vmem:[%s2262_s11 + $0x58] sm:$0xff]  ;;  %v268_v13 = vld [vmem:[%s2262_s11 + $0xd0] sm:$0xff]  ;;  %v254_v23 = vld [vmem:[%s2262_s11 + $0x60] sm:$0xff] }
  0x35   : > { %1978 = vtanh.f32 %v331_v32  ;;  %v319_v52 = vadd.f32 %v2286_v22, %v286_v38  ;;  %v334_v53 = vadd.f32 %v2286_v22, %v301_v39  ;;  %v288_v54 = vmul.f32 %v2257_v7, %v249_v40  ;;  %v269_v17 = vld [vmem:[%s2262_s11 + $0xd8] sm:$0xff]  ;;  %v255_v28 = vld [vmem:[%s2262_s11 + $0x68] sm:$0xff] }
  0x36   : > { %1980 = vtanh.f32 %v316_v33  ;;  %v303_v55 = vmul.f32 %v2257_v7, %v264_v41  ;;  %v304_v56 = vmul.f32 %v2257_v7, %v265_v42  ;;  %v289_v57 = vmul.f32 %v2257_v7, %v250_v45 }
  0x37   : > { %1982 = vtanh.f32 %v317_v37  ;;  %v290_v59 = vmul.f32 %v2257_v7, %v251_v46  ;;  %v305_v60 = vmul.f32 %v2257_v7, %v266_v47  ;;  %v306_v61 = vmul.f32 %v2257_v7, %v267_v51 }
  0x38   : > { %1984 = vtanh.f32 %v332_v43  ;;  %v335_v0 = vadd.f32 %v2286_v22, %v302_v49  ;;  %v320_v9 = vadd.f32 %v2286_v22, %v287_v50  ;;  %v321_v10 = vadd.f32 %v2286_v22, %v288_v54 }
  0x39   : > { %1986 = vtanh.f32 %v333_v44  ;;  %v291_v12 = vmul.f32 %v2257_v7, %v252_v58  ;;  %v336_v14 = vadd.f32 %v2286_v22, %v303_v55  ;;  %v337_v15 = vadd.f32 %v2286_v22, %v304_v56 }
  0x3a   : > { %1988 = vtanh.f32 %v318_v48  ;;  %v322_v16 = vadd.f32 %v2286_v22, %v289_v57  ;;  %v323_v19 = vadd.f32 %v2286_v22, %v290_v59  ;;  %v338_v20 = vadd.f32 %v2286_v22, %v305_v60 }
  0x3b   : > { %1990 = vtanh.f32 %v319_v52  ;;  %v2353_v21 = vadd.f32 %v2286_v22, %v306_v61  ;;  %v292_v26 = vmul.f32 %v2257_v7, %v253_v11  ;;  %v307_v27 = vmul.f32 %v2257_v7, %v268_v13 }
  0x3c   : > { %v1973_v18 = vpop.eup %1972  ;;  %1992 = vtanh.f32 %v334_v53  ;;  %v2362_v31 = vadd.f32 %v2286_v22, %v291_v12  ;;  %v2365_v32 = vmul.f32 %v2257_v7, %v269_v17  ;;  %v2370_v36 = vmul.f32 %v2257_v7, %v254_v23 }
  0x3d   : > { %v1975_v24 = vpop.eup %1974  ;;  %v379_v25 = vmul.f32 %v1973_v18, %v2335_v62  ;;  %1994 = vtanh.f32 %v335_v0  ;;  %v2375_v40 = vmul.f32 %v2257_v7, %v255_v28  ;;  %v2380_v44 = vadd.f32 %v2286_v22, %v292_v26 }
  0x3e   : > { %v1977_v29 = vpop.eup %1976  ;;  %v380_v30 = vmul.f32 %v1975_v24, %v2335_v62  ;;  %1996 = vtanh.f32 %v320_v9  ;;  %v2389_v52 = vadd.f32 %v2286_v22, %v307_v27 }
  0x3f   : > { %v1979_v33 = vpop.eup %1978  ;;  %v412_v34 = vadd.f32 %v2338_v63, %v379_v25  ;;  %v395_v35 = vmul.f32 %v1977_v29, %v2335_v62  ;;  %1998 = vtanh.f32 %v321_v10 }
  0x40   : > { %v1981_v37 = vpop.eup %1980  ;;  %v413_v38 = vadd.f32 %v2338_v63, %v380_v30  ;;  %v396_v39 = vmul.f32 %v1979_v33, %v2335_v62  ;;  %2000 = vtanh.f32 %v336_v14 }
  0x41   : > { %v1983_v41 = vpop.eup %1982  ;;  %v428_v42 = vadd.f32 %v2338_v63, %v395_v35  ;;  %v381_v43 = vmul.f32 %v1981_v37, %v2335_v62  ;;  %2002 = vtanh.f32 %v337_v15  ;;  %v2423_v37 = vld [vmem:[%s2991_s2 + $0x20] ss:$12 sps:$4 sm:$0xff]  }
  0x42   : > { %v1985_v45 = vpop.eup %1984  ;;  %v2382_v46 = vpack.c.bf16 %v413_v38, %v412_v34  ;;  %v429_v47 = vadd.f32 %v2338_v63, %v396_v39  ;;  %v382_v48 = vmul.f32 %v1983_v41, %v2335_v62  ;;  %2004 = vtanh.f32 %v322_v16 }
  0x43   : > { %v1987_v49 = vpop.eup %1986  ;;  %v414_v50 = vadd.f32 %v2338_v63, %v381_v43  ;;  %v397_v51 = vmul.f32 %v1985_v45, %v2335_v62  ;;  %2006 = vtanh.f32 %v323_v19 }
  0x44   : > { %v1989_v53 = vpop.eup %1988  ;;  %v460_v54 = vunpack.c.l.bf16 %v2382_v46  ;;  %v461_v55 = vunpack.c.h.bf16 %v2382_v46  ;;  %v2393_v56 = vpack.c.bf16 %v429_v47, %v428_v42  ;;  %v415_v57 = vadd.f32 %v2338_v63, %v382_v48 }
  0x45   : > { %v1991_v58 = vpop.eup %1990  ;;  %v398_v59 = vmul.f32 %v1987_v49, %v2335_v62  ;;  %v430_v60 = vadd.f32 %v2338_v63, %v397_v51  ;;  %v383_v61 = vmul.f32 %v1989_v53, %v2335_v62  ;;  %2008 = vtanh.f32 %v338_v20 }
  0x46   : > { %v1993_v0 = vpop.eup %1992  ;;  %v492_v9 = vsub.f32 %v412_v34, %v460_v54  ;;  %v493_v10 = vsub.f32 %v413_v38, %v461_v55  ;;  %v476_v11 = vunpack.c.l.bf16 %v2393_v56  ;;  %v477_v12 = vunpack.c.h.bf16 %v2393_v56 }
  0x47   : > { %v1995_v13 = vpop.eup %1994  ;;  %v2401_v14 = vpack.c.bf16 %v415_v57, %v414_v50  ;;  %v431_v15 = vadd.f32 %v2338_v63, %v398_v59  ;;  %v384_v16 = vmul.f32 %v1991_v58, %v2335_v62  ;;  %v416_v17 = vadd.f32 %v2338_v63, %v383_v61 }
  0x48   : > { %v1997_v18 = vpop.eup %1996  ;;  %v2406_v19 = vpack.c.bf16 %v493_v10, %v492_v9  ;;  %v508_v20 = vsub.f32 %v428_v42, %v476_v11  ;;  %v509_v23 = vsub.f32 %v429_v47, %v477_v12  ;;  %v399_v24 = vmul.f32 %v1993_v0, %v2335_v62  ;;  %v270_v0 = vld [vmem:[%s2262_s11 + $0xe0] sm:$0xff] }
  0x49   : > { %v1999_v25 = vpop.eup %1998  ;;  %v462_v26 = vunpack.c.l.bf16 %v2401_v14  ;;  %v463_v27 = vunpack.c.h.bf16 %v2401_v14  ;;  %v2411_v28 = vpack.c.bf16 %v431_v15, %v430_v60  ;;  %v417_v29 = vadd.f32 %v2338_v63, %v384_v16 }
  0x4a   : > { %v2001_v30 = vpop.eup %2000  ;;  %1617 = vmatmul.mubr.msk.bf16.vlgmr.msra.gmra.mrb[0].mxu0 %vm600_vm0, %v2406_v19  ;;  %v2416_v33 = vpack.c.bf16 %v509_v23, %v508_v20  ;;  %v400_v34 = vmul.f32 %v1995_v13, %v2335_v62  ;;  %v432_v35 = vadd.f32 %v2338_v63, %v399_v24  ;;  %v385_v38 = vmul.f32 %v1997_v18, %v2335_v62  ;;  %v271_v18 = vld [vmem:[%s2262_s11 + $0xe8] sm:$0xff] }
  0x4b   : > { %v2003_v39 = vpop.eup %2002  ;;  %1052 = vmatpush1.bf16.msra.mxu0 %v2224_v1  ;;  %691 = vmatprep.mubr.bf16.mxu0 %v2120_v2  ;;  %v494_v41 = vsub.f32 %v414_v50, %v462_v26  ;;  %v495_v42 = vsub.f32 %v415_v57, %v463_v27  ;;  %v478_v43 = vunpack.c.l.bf16 %v2411_v28  ;;  %v479_v45 = vunpack.c.h.bf16 %v2411_v28 }
  0x4c   : > { %v2005_v47 = vpop.eup %2004  ;;  %1625 = vmatmul.mubr.msk.bf16.vlgmr.msra.gmra.mrb[0].mxu1 %vm600_vm0, %v2416_v33  ;;  %v2432_v48 = vpack.c.bf16 %v417_v29, %v416_v17  ;;  %v433_v49 = vadd.f32 %v2338_v63, %v400_v34  ;;  %1053 = vmatprep.subr.bf16.mxu0 %v2232_v3  ;;  %v386_v1 = vmul.f32 %v1999_v25, %v2335_v62  ;;  %2010 = vtanh.f32 %v2353_v21 }
  0x4d   : > { %v2007_v50 = vpop.eup %2006  ;;  %1729 = vmatpush3.bf16.msra.mxu1 %v2267_v8  ;;  %771 = vmatprep.mubr.bf16.mxu1 %v2120_v2  ;;  %v2440_v51 = vpack.c.bf16 %v495_v42, %v494_v41  ;;  %v510_v53 = vsub.f32 %v430_v60, %v478_v43  ;;  %v511_v54 = vsub.f32 %v431_v15, %v479_v45  ;;  %2012 = vtanh.f32 %v2362_v31  ;;  %v256_v42 = vld [vmem:[%s2262_s11 + $0x70] sm:$0xff] }
  0x4e   : > { %v464_v55 = vunpack.c.l.bf16 %v2432_v48  ;;  %v465_v3 = vunpack.c.h.bf16 %v2432_v48  ;;  %v2445_v57 = vpack.c.bf16 %v433_v49, %v432_v35  ;;  %1730 = vmatprep.subr.bf16.mxu1 %v2423_v37  ;;  %v418_v21 = vadd.f32 %v2338_v63, %v385_v38 }
  0x4f   : > { %v2009_v58 = vpop.eup %2008  ;;  %v2449_v59 = vpack.c.bf16 %v511_v54, %v510_v53  ;;  %1054 = vmatpush1.bf16.msra.mxu0 %v2239_v4  ;;  %v419_v60 = vadd.f32 %v2338_v63, %v386_v1  ;;  %v401_v31 = vmul.f32 %v2001_v30, %v2335_v62  ;;  %v402_v61 = vmul.f32 %v2003_v39, %v2335_v62  ;;  %v2462_v4 = vld [vmem:[%s2991_s2 + $0x38] ss:$12 sps:$4 sm:$0xff]  }
  0x50   : > { %v496_v9 = vsub.f32 %v416_v17, %v464_v55  ;;  %v497_v10 = vsub.f32 %v417_v29, %v465_v3  ;;  %v480_v11 = vunpack.c.l.bf16 %v2445_v57  ;;  %v481_v12 = vunpack.c.h.bf16 %v2445_v57  ;;  %1055 = vmatprep.subr.bf16.mxu0 %v2247_v5  ;;  %v257_v53 = vld [vmem:[%s2262_s11 + $0x78] sm:$0xff]  ;;  %v272_v3 = vld [vmem:[%s2262_s11 + $0xf0] sm:$0xff] }
  0x51   : > { %v2464_v13 = vpack.c.bf16 %v419_v60, %v418_v21  ;;  %v434_v15 = vadd.f32 %v2338_v63, %v401_v31  ;;  %v435_v16 = vadd.f32 %v2338_v63, %v402_v61  ;;  %1731 = vmatpush3.bf16.msra.mxu1 %v2423_v37  ;;  %v387_v17 = vmul.f32 %v2005_v47, %v2335_v62 }
  0x52   : > { %1618 = vmatmul.mubr.msk.bf16.gmra.mrb[4].mxu0 %vm600_vm0, %v2440_v51  ;;  %v388_v5 = vmul.f32 %v2007_v50, %v2335_v62  ;;  %v341_v20 = vadd.f32 %v2286_v22, %v2365_v32  ;;  %v326_v23 = vadd.f32 %v2286_v22, %v2370_v36  ;;  %v309_v24 = vmul.f32 %v2257_v7, %v270_v0 }
  0x53   : > { %701 = vmatprep.mubr.bf16.mxu0 %v2120_v2  ;;  %v512_v25 = vsub.f32 %v432_v35, %v480_v11  ;;  %v513_v26 = vsub.f32 %v433_v49, %v481_v12  ;;  %v2480_v27 = vpack.c.bf16 %v435_v16, %v434_v15  ;;  %1056 = vmatpush1.bf16.msra.mxu0 %v2252_v6  ;;  %v466_v29 = vunpack.c.l.bf16 %v2464_v13 }
  0x54   : > { %1626 = vmatmul.mubr.msk.bf16.gmra.mrb[4].mxu1 %vm600_vm0, %v2449_v59  ;;  %v403_v32 = vmul.f32 %v2009_v58, %v2335_v62  ;;  %2014 = vtanh.f32 %v2380_v44  ;;  %1732 = vmatprep.subr.bf16.mxu1 %v2462_v4  ;;  %v310_v36 = vmul.f32 %v2257_v7, %v271_v18  ;;  %v2491_v30 = vpack.c.bf16 %v497_v10, %v496_v9  ;;  %v273_v58 = vld [vmem:[%s2262_s11 + $0xf8] sm:$0xff] }
  0x55   : > { %781 = vmatprep.mubr.bf16.mxu1 %v2120_v2  ;;  %v467_v6 = vunpack.c.h.bf16 %v2464_v13  ;;  %v420_v34 = vadd.f32 %v2338_v63, %v387_v17  ;;  %1733 = vmatpush3.bf16.msra.mxu1 %v2462_v4  ;;  %v327_v35 = vadd.f32 %v2286_v22, %v2375_v40  ;;  %v482_v44 = vunpack.c.l.bf16 %v2480_v27 }
  0x56   : > { %v2011_v38 = vpop.eup %2010  ;;  %v483_v39 = vunpack.c.h.bf16 %v2480_v27  ;;  %v421_v41 = vadd.f32 %v2338_v63, %v388_v5  ;;  %2016 = vtanh.f32 %v2389_v52  ;;  %1766 = vmatprep.subr.bf16.mxu1 %v2267_v8  ;;  %v2504_v45 = vpack.c.bf16 %v513_v26, %v512_v25 }
  0x57   : > { %v2013_v43 = vpop.eup %2012  ;;  %v404_v40 = vmul.f32 %v2011_v38, %v2335_v62  ;;  %v342_v47 = vadd.f32 %v2286_v22, %v309_v24  ;;  %v498_v49 = vsub.f32 %v418_v21, %v466_v29  ;;  %v436_v1 = vadd.f32 %v2338_v63, %v403_v32 }
  0x58   : > { %2018 = vtanh.f32 %v341_v20  ;;  %v343_v50 = vadd.f32 %v2286_v22, %v310_v36  ;;  %v499_v52 = vsub.f32 %v419_v60, %v467_v6  ;;  %v295_v55 = vmul.f32 %v2257_v7, %v256_v42 }
  0x59   : > { %v437_v54 = vadd.f32 %v2338_v63, %v404_v40  ;;  %2020 = vtanh.f32 %v326_v23  ;;  %v514_v31 = vsub.f32 %v434_v15, %v482_v44  ;;  %v515_v61 = vsub.f32 %v435_v16, %v483_v39 }
  0x5a   : > { %1619 = vmatmul.mubr.msk.bf16.gmra.mrb[8].mxu0 %vm600_vm0, %v2491_v30  ;;  %v2517_v21 = vpack.c.bf16 %v421_v41, %v420_v34  ;;  %2022 = vtanh.f32 %v327_v35  ;;  %v389_v0 = vmul.f32 %v2013_v43, %v2335_v62  ;;  %v296_v60 = vmul.f32 %v2257_v7, %v257_v53 }
  0x5b   : > { %711 = vmatprep.mubr.bf16.mxu0 %v2120_v2  ;;  %2024 = vtanh.f32 %v342_v47  ;;  %v328_v9 = vadd.f32 %v2286_v22, %v295_v55  ;;  %v2525_v10 = vpack.c.bf16 %v437_v54, %v436_v1  ;;  %v311_v11 = vmul.f32 %v2257_v7, %v272_v3 }
  0x5c   : > { %1627 = vmatmul.mubr.msk.bf16.gmra.mrb[8].mxu1 %vm600_vm0, %v2504_v45  ;;  %2026 = vtanh.f32 %v343_v50  ;;  %v312_v12 = vmul.f32 %v2257_v7, %v273_v58  ;;  %v2530_v15 = vpack.c.bf16 %v499_v52, %v498_v49  ;;  %v329_v16 = vadd.f32 %v2286_v22, %v296_v60 }
  0x5d   : > { %791 = vmatprep.mubr.bf16.mxu1 %v2120_v2  ;;  %2028 = vtanh.f32 %v328_v9  ;;  %v468_v18 = vunpack.c.l.bf16 %v2517_v21  ;;  %v469_v5 = vunpack.c.h.bf16 %v2517_v21  ;;  %v344_v20 = vadd.f32 %v2286_v22, %v311_v11 }
  0x5e   : > { %v2015_v17 = vpop.eup %2014  ;;  %v345_v23 = vadd.f32 %v2286_v22, %v312_v12  ;;  %v422_v7 = vadd.f32 %v2338_v63, %v389_v0  ;;  %2030 = vtanh.f32 %v329_v16  ;;  %v2539_v26 = vpack.c.bf16 %v515_v61, %v514_v31 }
  0x5f   : > { %v390_v24 = vmul.f32 %v2015_v17, %v2335_v62  ;;  %v484_v29 = vunpack.c.l.bf16 %v2525_v10  ;;  %v485_v32 = vunpack.c.h.bf16 %v2525_v10  ;;  %2032 = vtanh.f32 %v344_v20 }
  0x60   : > { %v2017_v25 = vpop.eup %2016  ;;  %2034 = vtanh.f32 %v345_v23  ;;  %v500_v22 = vsub.f32 %v420_v34, %v468_v18  ;;  %v501_v38 = vsub.f32 %v421_v41, %v469_v5 }
  0x61   : > { %v423_v36 = vadd.f32 %v2338_v63, %v390_v24  ;;  %v405_v6 = vmul.f32 %v2017_v25, %v2335_v62  ;;  %v516_v47 = vsub.f32 %v436_v1, %v484_v29  ;;  %v517_v49 = vsub.f32 %v437_v54, %v485_v32 }
  0x62   : > { %v2019_v35 = vpop.eup %2018  ;;  %1620 = vmatmul.mubr.msk.bf16.gmra.mrb[12].mxu0 %vm600_vm0, %v2530_v15  ;;  %v2560_v58 = vpack.c.bf16 %v501_v38, %v500_v22 }
  0x63   : > { %v2021_v44 = vpop.eup %2020  ;;  %721 = vmatprep.mubr.bf16.mxu0 %v2120_v2  ;;  %v2548_v39 = vpack.c.bf16 %v423_v36, %v422_v7  ;;  %v406_v42 = vmul.f32 %v2019_v35, %v2335_v62  ;;  %v438_v43 = vadd.f32 %v2338_v63, %v405_v6  ;;  %v2567_v60 = vpack.c.bf16 %v517_v49, %v516_v47 }
  0x64   : > { %v2023_v40 = vpop.eup %2022  ;;  %1628 = vmatmul.mubr.msk.bf16.gmra.mrb[12].mxu1 %vm600_vm0, %v2539_v26  ;;  %v391_v50 = vmul.f32 %v2021_v44, %v2335_v62 }
  0x65   : > { %v2025_v53 = vpop.eup %2024  ;;  %801 = vmatprep.mubr.bf16.mxu1 %v2120_v2  ;;  %v470_v34 = vunpack.c.l.bf16 %v2548_v39  ;;  %v471_v41 = vunpack.c.h.bf16 %v2548_v39  ;;  %v439_v52 = vadd.f32 %v2338_v63, %v406_v42  ;;  %v392_v55 = vmul.f32 %v2023_v40, %v2335_v62 }
  0x66   : > { %v2027_v3 = vpop.eup %2026  ;;  %v424_v31 = vadd.f32 %v2338_v63, %v391_v50  ;;  %v407_v1 = vmul.f32 %v2025_v53, %v2335_v62 }
  0x67   : > { %v2029_v54 = vpop.eup %2028  ;;  %v2564_v61 = vpack.c.bf16 %v439_v52, %v438_v43  ;;  %v425_v0 = vadd.f32 %v2338_v63, %v392_v55  ;;  %v408_v9 = vmul.f32 %v2027_v3, %v2335_v62  ;;  %v502_v16 = vsub.f32 %v422_v7, %v470_v34 }
  0x68   : > { %v440_v11 = vadd.f32 %v2338_v63, %v407_v1  ;;  %v2031_v12 = vpop.eup %2030  ;;  %v503_v17 = vsub.f32 %v423_v36, %v471_v41  ;;  %v393_v25 = vmul.f32 %v2029_v54, %v2335_v62 }
  0x69   : > { %v486_v18 = vunpack.c.l.bf16 %v2564_v61  ;;  %v487_v5 = vunpack.c.h.bf16 %v2564_v61  ;;  %v2033_v20 = vpop.eup %2032  ;;  %v2575_v23 = vpack.c.bf16 %v425_v0, %v424_v31  ;;  %v441_v24 = vadd.f32 %v2338_v63, %v408_v9 }
  0x6a   : > { %1621 = vmatmul.mubr.msk.bf16.gmra.mrb[16].mxu0 %vm600_vm0, %v2560_v58  ;;  %v394_v29 = vmul.f32 %v2031_v12, %v2335_v62  ;;  %v2035_v32 = vpop.eup %2034  ;;  %v409_v35 = vmul.f32 %v2033_v20, %v2335_v62  ;;  %v529_v38 = vpack.c.bf16 %v503_v17, %v502_v16  ;;  %v426_v40 = vadd.f32 %v2338_v63, %v393_v25 }
  0x6b   : > { %731 = vmatprep.mubr.bf16.mxu0 %v2120_v2  ;;  %v518_v7 = vsub.f32 %v438_v43, %v486_v18  ;;  %v519_v36 = vsub.f32 %v439_v52, %v487_v5  ;;  %v2583_v6 = vpack.c.bf16 %v441_v24, %v440_v11  ;;  %v410_v22 = vmul.f32 %v2035_v32, %v2335_v62 }
  0x6c   : > { %1629 = vmatmul.mubr.msk.bf16.gmra.mrb[16].mxu1 %vm600_vm0, %v2567_v60  ;;  %v472_v44 = vunpack.c.l.bf16 %v2575_v23  ;;  %v473_v42 = vunpack.c.h.bf16 %v2575_v23  ;;  %v427_v43 = vadd.f32 %v2338_v63, %v394_v29  ;;  %v442_v53 = vadd.f32 %v2338_v63, %v409_v35 }
  0x6d   : > { %811 = vmatprep.mubr.bf16.mxu1 %v2120_v2  ;;  %v2592_v47 = vpack.c.bf16 %v519_v36, %v518_v7  ;;  %v488_v49 = vunpack.c.l.bf16 %v2583_v6  ;;  %v489_v50 = vunpack.c.h.bf16 %v2583_v6  ;;  %v443_v62 = vadd.f32 %v2338_v63, %v410_v22 }
  0x6e   : > { %v504_v34 = vsub.f32 %v424_v31, %v472_v44  ;;  %v505_v41 = vsub.f32 %v425_v0, %v473_v42  ;;  %v2599_v52 = vpack.c.bf16 %v427_v43, %v426_v40 }
  0x6f   : > { %v520_v55 = vsub.f32 %v440_v11, %v488_v49  ;;  %v521_v3 = vsub.f32 %v441_v24, %v489_v50  ;;  %v2604_v1 = vpack.c.bf16 %v443_v62, %v442_v53 }
  0x70   : > { %v530_v54 = vpack.c.bf16 %v505_v41, %v504_v34  ;;  %v474_v63 = vunpack.c.l.bf16 %v2599_v52  ;;  %v475_v9 = vunpack.c.h.bf16 %v2599_v52 }
  0x71   : > { %v538_v31 = vpack.c.bf16 %v521_v3, %v520_v55  ;;  %v490_v0 = vunpack.c.l.bf16 %v2604_v1  ;;  %v491_v12 = vunpack.c.h.bf16 %v2604_v1 }
  0x72   : > { %1622 = vmatmul.mubr.msk.bf16.gmra.mrb[20].mxu0 %vm600_vm0, %v529_v38  ;;  %v506_v16 = vsub.f32 %v426_v40, %v474_v63  ;;  %v507_v17 = vsub.f32 %v427_v43, %v475_v9 }
  0x73   : > { %741 = vmatprep.mubr.bf16.mxu0 %v2120_v2  ;;  %v522_v11 = vsub.f32 %v442_v53, %v490_v0  ;;  %v523_v18 = vsub.f32 %v443_v62, %v491_v12 }
  0x74   : > { %1630 = vmatmul.mubr.msk.bf16.gmra.mrb[20].mxu1 %vm600_vm0, %v2592_v47  ;;  %v531_v5 = vpack.c.bf16 %v507_v17, %v506_v16 }
  0x75   : > { %821 = vmatprep.mubr.bf16.mxu1 %v2120_v2  ;;  %v539_v20 = vpack.c.bf16 %v523_v18, %v522_v11 }
  0x7a   : > { %1623 = vmatmul.mubr.msk.bf16.gmra.mrb[24].mxu0 %vm600_vm0, %v530_v54 }
  0x7b   : > { %751 = vmatprep.mubr.bf16.mxu0 %v2120_v2 }
  0x7c   : > { %1631 = vmatmul.mubr.msk.bf16.gmra.mrb[24].mxu1 %vm600_vm0, %v538_v31 }
  0x7d   : > { %831 = vmatprep.mubr.bf16.mxu1 %v2120_v2 }
  0x82   : > { %1624 = vmatmul.mubr.msk.bf16.gmra.mrb[28].mxu0 %vm600_vm0, %v531_v5 }
  0x83   : > { %1083 = vmatprep.mubr.bf16.mxu0 %v2120_v2 }
  0x84   : > { %1632 = vmatmul.mubr.msk.bf16.gmra.mrb[28].mxu1 %vm600_vm0, %v539_v20 }
  0x85   : > { %1734 = vmatprep.mubr.msk.bf16.mxu1 %vm600_vm0, %v2406_v19 }
  0x8a   : > { %1649 = vmatmul.mubr.msk.bf16.vlgmr.msra.gmra.mrb[0].mxu0 %vm600_vm0, %v2382_v46 }
  0x8b   : > { %1093 = vmatprep.mubr.bf16.mxu0 %v2120_v2 }
  0x8c   : > { %1735 = vmatmul.mubr.msk.bf16.vlgmr.msra.gmra.mrb[32].mxu1 %vm600_vm0, %v2440_v51 }
  0x8d   : > { %1767 = vmatpush3.bf16.msra.mxu1 %v2267_v8  ;;  %1738 = vmatprep.mubr.msk.bf16.mxu1 %vm600_vm0, %v2491_v30 }
  0x8e   : > { %1768 = vmatprep.subr.bf16.mxu1 %v2423_v37 }
  0x91   : > { %1769 = vmatpush3.bf16.msra.mxu1 %v2423_v37 }
  0x92   : > { %1650 = vmatmul.mubr.msk.bf16.gmra.mrb[4].mxu0 %vm600_vm0, %v2401_v14  ;;  %1770 = vmatprep.subr.bf16.mxu1 %v2462_v4 }
  0x93   : > { %1103 = vmatprep.mubr.bf16.mxu0 %v2120_v2 }
  0x94   : > { %1739 = vmatmul.mubr.msk.bf16.gmra.mrb[36].mxu1 %vm600_vm0, %v2530_v15 }
  0x95   : > { %1742 = vmatprep.mubr.msk.bf16.mxu1 %vm600_vm0, %v2560_v58  ;;  %1771 = vmatpush3.bf16.msra.mxu1 %v2462_v4 }
  0x9a   : > { %1651 = vmatmul.mubr.msk.bf16.gmra.mrb[8].mxu0 %vm600_vm0, %v2432_v48 }
  0x9b   : > { %1113 = vmatprep.mubr.bf16.mxu0 %v2120_v2 }
  0x9c   : > { %1743 = vmatmul.mubr.msk.bf16.gmra.mrb[40].mxu1 %vm600_vm0, %v529_v38 }
  0x9d   : > { %1746 = vmatprep.mubr.msk.bf16.mxu1 %vm600_vm0, %v530_v54 }
  0xa2   : > { %1652 = vmatmul.mubr.msk.bf16.gmra.mrb[12].mxu0 %vm600_vm0, %v2464_v13 }
  0xa3   : > { %1123 = vmatprep.mubr.bf16.mxu0 %v2120_v2 }
  0xa4   : > { %1747 = vmatmul.mubr.msk.bf16.gmra.mrb[44].mxu1 %vm600_vm0, %v531_v5 }
  0xa5   : > { %1750 = vmatprep.mubr.msk.bf16.mxu1 %vm600_vm0, %v2416_v33 }
  0xaa   : > { %1653 = vmatmul.mubr.msk.bf16.gmra.mrb[16].mxu0 %vm600_vm0, %v2517_v21 }
  0xab   : > { %1133 = vmatprep.mubr.bf16.mxu0 %v2120_v2 }
  0xac   : > { %1751 = vmatmul.mubr.msk.bf16.gmra.mrb[48].mxu1 %vm600_vm0, %v2449_v59 }
  0xad   : > { %1754 = vmatprep.mubr.msk.bf16.mxu1 %vm600_vm0, %v2504_v45 }
  0xb2   : > { %1654 = vmatmul.mubr.msk.bf16.gmra.mrb[20].mxu0 %vm600_vm0, %v2548_v39 }
  0xb3   : > { %1143 = vmatprep.mubr.bf16.mxu0 %v2120_v2 }
  0xb4   : > { %1755 = vmatmul.mubr.msk.bf16.gmra.mrb[52].mxu1 %vm600_vm0, %v2539_v26 }
  0xb5   : > { %1758 = vmatprep.mubr.msk.bf16.mxu1 %vm600_vm0, %v2567_v60 }
  0xba   : > { %1655 = vmatmul.mubr.msk.bf16.gmra.mrb[24].mxu0 %vm600_vm0, %v2575_v23 }
  0xbb   : > { %1153 = vmatprep.mubr.bf16.mxu0 %v2120_v2 }
  0xbc   : > { %1759 = vmatmul.mubr.msk.bf16.gmra.mrb[56].mxu1 %vm600_vm0, %v2592_v47 }
  0xbd   : > { %1762 = vmatprep.mubr.msk.bf16.mxu1 %vm600_vm0, %v538_v31 }
  0xc2   : > { %1656 = vmatmul.mubr.msk.bf16.gmra.mrb[28].mxu0 %vm600_vm0, %v2599_v52 }
  0xc3   : > { %1163 = vmatprep.mubr.bf16.mxu0 %v2120_v2 }
  0xc4   : > { %1763 = vmatmul.mubr.msk.bf16.gmra.mrb[60].mxu1 %vm600_vm0, %v539_v20 }
  0xc5   : > { %1772 = vmatprep.mubr.msk.bf16.mxu1 %vm600_vm0, %v2382_v46 }
  0xca   : > { %1657 = vmatmul.mubr.msk.bf16.gmra.mrb[32].mxu0 %vm600_vm0, %v2393_v56 }
  0xcb   : > { %1173 = vmatprep.mubr.bf16.mxu0 %v2120_v2 }
  0xcc   : > { %1773 = vmatmul.mubr.msk.bf16.vlgmr.msra.gmra.mrb[32].mxu1 %vm600_vm0, %v2401_v14 }
  0xcd   : > { %1776 = vmatprep.mubr.msk.bf16.mxu1 %vm600_vm0, %v2432_v48 }
  0xd2   : > { %1658 = vmatmul.mubr.msk.bf16.gmra.mrb[36].mxu0 %vm600_vm0, %v2411_v28 }
  0xd3   : > { %1183 = vmatprep.mubr.bf16.mxu0 %v2120_v2 }
  0xd4   : > { %1777 = vmatmul.mubr.msk.bf16.gmra.mrb[36].mxu1 %vm600_vm0, %v2464_v13 }
  0xd5   : > { %1780 = vmatprep.mubr.msk.bf16.mxu1 %vm600_vm0, %v2517_v21 }
  0xda   : > { %1659 = vmatmul.mubr.msk.bf16.gmra.mrb[40].mxu0 %vm600_vm0, %v2445_v57 }
  0xdb   : > { %1193 = vmatprep.mubr.bf16.mxu0 %v2120_v2 }
  0xdc   : > { %1781 = vmatmul.mubr.msk.bf16.gmra.mrb[40].mxu1 %vm600_vm0, %v2548_v39 }
  0xdd   : > { %1784 = vmatprep.mubr.msk.bf16.mxu1 %vm600_vm0, %v2575_v23 }
  0xe2   : > { %1660 = vmatmul.mubr.msk.bf16.gmra.mrb[44].mxu0 %vm600_vm0, %v2480_v27 }
  0xe3   : > { %1203 = vmatprep.mubr.bf16.mxu0 %v2120_v2 }
  0xe4   : > { %1785 = vmatmul.mubr.msk.bf16.gmra.mrb[44].mxu1 %vm600_vm0, %v2599_v52 }
  0xe5   : > { %1788 = vmatprep.mubr.msk.bf16.mxu1 %vm600_vm0, %v2393_v56 }
  0xea   : > { %1661 = vmatmul.mubr.msk.bf16.gmra.mrb[48].mxu0 %vm600_vm0, %v2525_v10 }
  0xeb   : > { %1213 = vmatprep.mubr.bf16.mxu0 %v2120_v2 }
  0xec   : > { %1789 = vmatmul.mubr.msk.bf16.gmra.mrb[48].mxu1 %vm600_vm0, %v2411_v28 }
  0xed   : > { %1792 = vmatprep.mubr.msk.bf16.mxu1 %vm600_vm0, %v2445_v57 }
  0xf2   : > { %1662 = vmatmul.mubr.msk.bf16.gmra.mrb[52].mxu0 %vm600_vm0, %v2564_v61 }
  0xf3   : > { %1223 = vmatprep.mubr.bf16.mxu0 %v2120_v2 }
  0xf4   : > { %1793 = vmatmul.mubr.msk.bf16.gmra.mrb[52].mxu1 %vm600_vm0, %v2480_v27 }
  0xf5   : > { %1796 = vmatprep.mubr.msk.bf16.mxu1 %vm600_vm0, %v2525_v10 }
  0xfa   : > { %1663 = vmatmul.mubr.msk.bf16.gmra.mrb[56].mxu0 %vm600_vm0, %v2583_v6 }
  0xfb   : > { %1233 = vmatprep.mubr.bf16.mxu0 %v2120_v2 }
  0xfc   : > { %1797 = vmatmul.mubr.msk.bf16.gmra.mrb[56].mxu1 %vm600_vm0, %v2564_v61 }
  0xfd   : > { %1800 = vmatprep.mubr.msk.bf16.mxu1 %vm600_vm0, %v2583_v6 }
 0x102   : > { %1664 = vmatmul.mubr.msk.bf16.gmra.mrb[60].mxu0 %vm600_vm0, %v2604_v1 }
 0x104   : > { %1801 = vmatmul.mubr.msk.bf16.gmra.mrb[60].mxu1 %vm600_vm0, %v2604_v1 }
 0x11f   : > { %v2730_v8 = vpop.f32.mrb[0].mxu1 }
 0x120   : > { %v2732_v46 = vpop.f32.mrb[1].mxu1 }
 0x121   : > { %v2734_v56 = vpop.f32.mrb[2].mxu1 }
 0x122   : > { %v2736_v2 = vpop.f32.mrb[3].mxu1 }
 0x127   : > { %v2738_v14 = vpop.f32.mrb[4].mxu1 }
 0x128   : > { %v2740_v19 = vpop.f32.mrb[5].mxu1 }
 0x129   : > { %v2742_v28 = vpop.f32.mrb[6].mxu1 }
 0x12a   : > { %v2744_v33 = vpop.f32.mrb[7].mxu1 }
 0x12f   : > { %v2746_v37 = vpop.f32.mrb[8].mxu1 }
 0x130   : > { %v2748_v48 = vpop.f32.mrb[9].mxu1 }
 0x131   : > { %v2750_v51 = vpop.f32.mrb[10].mxu1 }
 0x132   : > { %v2752_v57 = vpop.f32.mrb[11].mxu1 }
 0x137   : > { %v2754_v59 = vpop.f32.mrb[12].mxu1 }
 0x138   : > { %v2756_v4 = vpop.f32.mrb[13].mxu1 }
 0x139   : > { %v2758_v13 = vpop.f32.mrb[14].mxu1 }
 0x13a   : > { %v2760_v27 = vpop.f32.mrb[15].mxu1 }
 0x13f   : > { %v2762_v30 = vpop.f32.mrb[16].mxu1 }
 0x140   : > { %v2764_v45 = vpop.f32.mrb[17].mxu1 }
 0x141   : > { %v2766_v21 = vpop.f32.mrb[18].mxu1 }
 0x142   : > { %v2768_v10 = vpop.f32.mrb[19].mxu1 }
 0x147   : > { %v2770_v15 = vpop.f32.mrb[20].mxu1 }
 0x148   : > { %v2772_v26 = vpop.f32.mrb[21].mxu1 }
 0x149   : > { %v2774_v39 = vpop.f32.mrb[22].mxu1 }
 0x14a   : > { %v2776_v58 = vpop.f32.mrb[23].mxu1 }
 0x14f   : > { %v2778_v61 = vpop.f32.mrb[24].mxu1 }
 0x150   : > { %v2780_v60 = vpop.f32.mrb[25].mxu1 }
 0x151   : > { %v2782_v23 = vpop.f32.mrb[26].mxu1 }
 0x152   : > { %v2784_v24 = vpop.f32.mrb[27].mxu1 }
 0x157   : > { %v2786_v25 = vpop.f32.mrb[28].mxu1 }
 0x158   : > { %v2790_v29 = vpop.f32.mrb[29].mxu1 }
 0x159   : > { %v2792_v32 = vpop.f32.mrb[30].mxu1 }
 0x15a   : > { %v2794_v7 = vpop.f32.mrb[31].mxu1 }
 0x15d   : > { %v1085_v36 = vpop.f32.mrb[0].mxu0 }
 0x15e   : > { %1405 = vst [vmem:[%s2796_s5] sm:$0xff] %v1085_v36  ;;  %v1087_v6 = vpop.f32.mrb[1].mxu0 }
 0x15f   : > { %1406 = vst [vmem:[%s2796_s5 + $0x8] sm:$0xff] %v1087_v6  ;;  %v1089_v35 = vpop.f32.mrb[2].mxu0 }
 0x160   : > { %1408 = vst [vmem:[%s2796_s5 + $0x18] sm:$0xff] %v1089_v35  ;;  %v1091_v22 = vpop.f32.mrb[3].mxu0 }
 0x161   : > { %1409 = vst [vmem:[%s2796_s5 + $0x20] sm:$0xff] %v1091_v22 }
 0x165   : > { %v1095_v38 = vpop.f32.mrb[4].mxu0 }
 0x166   : > { %1411 = vst [vmem:[%s2796_s5 + $0x30] sm:$0xff] %v1095_v38  ;;  %v1097_v44 = vpop.f32.mrb[5].mxu0 }
 0x167   : > { %1412 = vst [vmem:[%s2796_s5 + $0x38] sm:$0xff] %v1097_v44  ;;  %v1099_v42 = vpop.f32.mrb[6].mxu0 }
 0x168   : > { %1414 = vst [vmem:[%s2796_s5 + $0x48] sm:$0xff] %v1099_v42  ;;  %v1101_v40 = vpop.f32.mrb[7].mxu0 }
 0x169   : > { %1415 = vst [vmem:[%s2796_s5 + $0x50] sm:$0xff] %v1101_v40 }
 0x16d   : > { %v1105_v43 = vpop.f32.mrb[8].mxu0 }
 0x16e   : > { %1417 = vst [vmem:[%s2796_s5 + $0x60] sm:$0xff] %v1105_v43  ;;  %v1107_v47 = vpop.f32.mrb[9].mxu0 }
 0x16f   : > { %1418 = vst [vmem:[%s2796_s5 + $0x68] sm:$0xff] %v1107_v47  ;;  %v1109_v49 = vpop.f32.mrb[10].mxu0 }
 0x170   : > { %1420 = vst [vmem:[%s2796_s5 + $0x78] sm:$0xff] %v1109_v49  ;;  %v1111_v50 = vpop.f32.mrb[11].mxu0 }
 0x171   : > { %1421 = vst [vmem:[%s2796_s5 + $0x80] sm:$0xff] %v1111_v50 }
 0x175   : > { %v1115_v53 = vpop.f32.mrb[12].mxu0 }
 0x176   : > { %1423 = vst [vmem:[%s2796_s5 + $0x90] sm:$0xff] %v1115_v53  ;;  %v1117_v62 = vpop.f32.mrb[13].mxu0 }
 0x177   : > { %1424 = vst [vmem:[%s2796_s5 + $0x98] sm:$0xff] %v1117_v62  ;;  %v1119_v34 = vpop.f32.mrb[14].mxu0 }
 0x178   : > { %1426 = vst [vmem:[%s2796_s5 + $0xa8] sm:$0xff] %v1119_v34  ;;  %v1121_v41 = vpop.f32.mrb[15].mxu0 }
 0x179   : > { %1427 = vst [vmem:[%s2796_s5 + $0xb0] sm:$0xff] %v1121_v41 }
 0x17d   : > { %v1125_v52 = vpop.f32.mrb[16].mxu0 }
 0x17e   : > { %1429 = vst [vmem:[%s2796_s5 + $0xc0] sm:$0xff] %v1125_v52  ;;  %v1127_v55 = vpop.f32.mrb[17].mxu0 }
 0x17f   : > { %1430 = vst [vmem:[%s2796_s5 + $0xc8] sm:$0xff] %v1127_v55  ;;  %v1129_v3 = vpop.f32.mrb[18].mxu0 }
 0x180   : > { %1432 = vst [vmem:[%s2796_s5 + $0xd8] sm:$0xff] %v1129_v3  ;;  %v1131_v1 = vpop.f32.mrb[19].mxu0 }
 0x181   : > { %1433 = vst [vmem:[%s2796_s5 + $0xe0] sm:$0xff] %v1131_v1 }
 0x185   : > { %v1135_v54 = vpop.f32.mrb[20].mxu0 }
 0x186   : > { %1435 = vst [vmem:[%s2796_s5 + $0xf0] sm:$0xff] %v1135_v54  ;;  %v1137_v63 = vpop.f32.mrb[21].mxu0 }
 0x187   : > { %1436 = vst [vmem:[%s2796_s5 + $0xf8] sm:$0xff] %v1137_v63  ;;  %v1139_v9 = vpop.f32.mrb[22].mxu0 }
 0x188   : > { %1438 = vst [vmem:[%s2796_s5 + $0x108] sm:$0xff] %v1139_v9  ;;  %v1141_v31 = vpop.f32.mrb[23].mxu0 }
 0x189   : > { %1439 = vst [vmem:[%s2796_s5 + $0x110] sm:$0xff] %v1141_v31 }
 0x18d   : > { %v1145_v0 = vpop.f32.mrb[24].mxu0 }
 0x18e   : > { %1441 = vst [vmem:[%s2796_s5 + $0x120] sm:$0xff] %v1145_v0  ;;  %v1147_v12 = vpop.f32.mrb[25].mxu0 }
 0x18f   : > { %1442 = vst [vmem:[%s2796_s5 + $0x128] sm:$0xff] %v1147_v12  ;;  %v1149_v16 = vpop.f32.mrb[26].mxu0 }
 0x190   : > { %1444 = vst [vmem:[%s2796_s5 + $0x138] sm:$0xff] %v1149_v16  ;;  %v1151_v17 = vpop.f32.mrb[27].mxu0 }
 0x191   : > { %1445 = vst [vmem:[%s2796_s5 + $0x140] sm:$0xff] %v1151_v17 }
 0x195   : > { %v1155_v11 = vpop.f32.mrb[28].mxu0 }
 0x196   : > { %1447 = vst [vmem:[%s2796_s5 + $0x150] sm:$0xff] %v1155_v11  ;;  %v1157_v18 = vpop.f32.mrb[29].mxu0 }
 0x197   : > { %1448 = vst [vmem:[%s2796_s5 + $0x158] sm:$0xff] %v1157_v18  ;;  %v1159_v5 = vpop.f32.mrb[30].mxu0 }
 0x198   : > { %1450 = vst [vmem:[%s2796_s5 + $0x168] sm:$0xff] %v1159_v5  ;;  %v1161_v20 = vpop.f32.mrb[31].mxu0 }
 0x199   : > { %1451 = vst [vmem:[%s2796_s5 + $0x170] sm:$0xff] %v1161_v20 }
 0x19d   : > { %v1165_v36 = vpop.f32.mrb[32].mxu0 }
 0x19e   : > { %v1166_v6 = vadd.f32 %v1165_v36, %v2730_v8  ;;  %v1167_v35 = vpop.f32.mrb[33].mxu0 }
 0x19f   : > { %v1774_v22 = vpop.f32.mrb[32].mxu1  ;;  %v1168_v38 = vadd.f32 %v1167_v35, %v2732_v46  ;;  %v1169_v44 = vpop.f32.mrb[34].mxu0 }
 0x1a0   : > { %1453 = vst [vmem:[%s2796_s5 + $0x180] sm:$0xff] %v1166_v6  ;;  %1413 = vst [vmem:[%s2796_s5 + $0x40] sm:$0xff] %v1774_v22  ;;  %v1278_v42 = vpop.f32.mrb[33].mxu1  ;;  %v1170_v40 = vadd.f32 %v1169_v44, %v2734_v56  ;;  %v1171_v43 = vpop.f32.mrb[35].mxu0 }
 0x1a1   : > { %1454 = vst [vmem:[%s2796_s5 + $0x188] sm:$0xff] %v1168_v38  ;;  %1407 = vst [vmem:[%s2796_s5 + $0x10] sm:$0xff] %v1278_v42  ;;  %v1775_v47 = vpop.f32.mrb[34].mxu1  ;;  %v1172_v8 = vadd.f32 %v1171_v43, %v2736_v2 }
 0x1a2   : > { %1456 = vst [vmem:[%s2796_s5 + $0x198] sm:$0xff] %v1170_v40  ;;  %1416 = vst [vmem:[%s2796_s5 + $0x58] sm:$0xff] %v1775_v47  ;;  %v1281_v49 = vpop.f32.mrb[35].mxu1 }
 0x1a3   : > { %1457 = vst [vmem:[%s2796_s5 + $0x1a0] sm:$0xff] %v1172_v8  ;;  %1410 = vst [vmem:[%s2796_s5 + $0x28] sm:$0xff] %v1281_v49 }
 0x1a5   : > { %v1175_v46 = vpop.f32.mrb[36].mxu0 }
 0x1a6   : > { %v1176_v56 = vadd.f32 %v1175_v46, %v2738_v14  ;;  %v1177_v50 = vpop.f32.mrb[37].mxu0 }
 0x1a7   : > { %v1778_v53 = vpop.f32.mrb[36].mxu1  ;;  %v1178_v62 = vadd.f32 %v1177_v50, %v2740_v19  ;;  %v1179_v34 = vpop.f32.mrb[38].mxu0 }
 0x1a8   : > { %1459 = vst [vmem:[%s2796_s5 + $0x1b0] sm:$0xff] %v1176_v56  ;;  %1425 = vst [vmem:[%s2796_s5 + $0xa0] sm:$0xff] %v1778_v53  ;;  %v1294_v2 = vpop.f32.mrb[37].mxu1  ;;  %v1180_v41 = vadd.f32 %v1179_v34, %v2742_v28  ;;  %v1181_v52 = vpop.f32.mrb[39].mxu0 }
 0x1a9   : > { %1460 = vst [vmem:[%s2796_s5 + $0x1b8] sm:$0xff] %v1178_v62  ;;  %1419 = vst [vmem:[%s2796_s5 + $0x70] sm:$0xff] %v1294_v2  ;;  %v1779_v55 = vpop.f32.mrb[38].mxu1  ;;  %v1182_v14 = vadd.f32 %v1181_v52, %v2744_v33 }
 0x1aa   : > { %1462 = vst [vmem:[%s2796_s5 + $0x1c8] sm:$0xff] %v1180_v41  ;;  %1428 = vst [vmem:[%s2796_s5 + $0xb8] sm:$0xff] %v1779_v55  ;;  %v1297_v3 = vpop.f32.mrb[39].mxu1 }
 0x1ab   : > { %1463 = vst [vmem:[%s2796_s5 + $0x1d0] sm:$0xff] %v1182_v14  ;;  %1422 = vst [vmem:[%s2796_s5 + $0x88] sm:$0xff] %v1297_v3 }
 0x1ad   : > { %v1185_v19 = vpop.f32.mrb[40].mxu0 }
 0x1ae   : > { %v1186_v28 = vadd.f32 %v1185_v19, %v2746_v37  ;;  %v1187_v1 = vpop.f32.mrb[41].mxu0 }
 0x1af   : > { %v1782_v54 = vpop.f32.mrb[40].mxu1  ;;  %v1188_v63 = vadd.f32 %v1187_v1, %v2748_v48  ;;  %v1189_v9 = vpop.f32.mrb[42].mxu0 }
 0x1b0   : > { %1465 = vst [vmem:[%s2796_s5 + $0x1e0] sm:$0xff] %v1186_v28  ;;  %1437 = vst [vmem:[%s2796_s5 + $0x100] sm:$0xff] %v1782_v54  ;;  %v1310_v33 = vpop.f32.mrb[41].mxu1  ;;  %v1190_v31 = vadd.f32 %v1189_v9, %v2750_v51  ;;  %v1191_v0 = vpop.f32.mrb[43].mxu0 }
 0x1b1   : > { %1466 = vst [vmem:[%s2796_s5 + $0x1e8] sm:$0xff] %v1188_v63  ;;  %1431 = vst [vmem:[%s2796_s5 + $0xd0] sm:$0xff] %v1310_v33  ;;  %v1783_v12 = vpop.f32.mrb[42].mxu1  ;;  %v1192_v37 = vadd.f32 %v1191_v0, %v2752_v57 }
 0x1b2   : > { %1468 = vst [vmem:[%s2796_s5 + $0x1f8] sm:$0xff] %v1190_v31  ;;  %1440 = vst [vmem:[%s2796_s5 + $0x118] sm:$0xff] %v1783_v12  ;;  %v1313_v16 = vpop.f32.mrb[43].mxu1 }
 0x1b3   : > { %1469 = vst [vmem:[%s2796_s5 + $0x200] sm:$0xff] %v1192_v37  ;;  %1434 = vst [vmem:[%s2796_s5 + $0xe8] sm:$0xff] %v1313_v16 }
 0x1b5   : > { %v1195_v48 = vpop.f32.mrb[44].mxu0 }
 0x1b6   : > { %v1196_v51 = vadd.f32 %v1195_v48, %v2754_v59  ;;  %v1197_v17 = vpop.f32.mrb[45].mxu0 }
 0x1b7   : > { %v1786_v11 = vpop.f32.mrb[44].mxu1  ;;  %v1198_v18 = vadd.f32 %v1197_v17, %v2756_v4  ;;  %v1199_v5 = vpop.f32.mrb[46].mxu0 }
 0x1b8   : > { %1471 = vst [vmem:[%s2796_s5 + $0x210] sm:$0xff] %v1196_v51  ;;  %1449 = vst [vmem:[%s2796_s5 + $0x160] sm:$0xff] %v1786_v11  ;;  %v1326_v57 = vpop.f32.mrb[45].mxu1  ;;  %v1200_v20 = vadd.f32 %v1199_v5, %v2758_v13  ;;  %v1201_v36 = vpop.f32.mrb[47].mxu0 }
 0x1b9   : > { %1472 = vst [vmem:[%s2796_s5 + $0x218] sm:$0xff] %v1198_v18  ;;  %1443 = vst [vmem:[%s2796_s5 + $0x130] sm:$0xff] %v1326_v57  ;;  %v1787_v6 = vpop.f32.mrb[46].mxu1  ;;  %v1202_v59 = vadd.f32 %v1201_v36, %v2760_v27 }
 0x1ba   : > { %1474 = vst [vmem:[%s2796_s5 + $0x228] sm:$0xff] %v1200_v20  ;;  %1452 = vst [vmem:[%s2796_s5 + $0x178] sm:$0xff] %v1787_v6  ;;  %v1329_v35 = vpop.f32.mrb[47].mxu1 }
 0x1bb   : > { %1475 = vst [vmem:[%s2796_s5 + $0x230] sm:$0xff] %v1202_v59  ;;  %1446 = vst [vmem:[%s2796_s5 + $0x148] sm:$0xff] %v1329_v35 }
 0x1bd   : > { %v1205_v4 = vpop.f32.mrb[48].mxu0 }
 0x1be   : > { %v1206_v13 = vadd.f32 %v1205_v4, %v2762_v30  ;;  %v1207_v22 = vpop.f32.mrb[49].mxu0 }
 0x1bf   : > { %v1790_v38 = vpop.f32.mrb[48].mxu1  ;;  %v1208_v44 = vadd.f32 %v1207_v22, %v2764_v45  ;;  %v1209_v42 = vpop.f32.mrb[50].mxu0 }
 0x1c0   : > { %1477 = vst [vmem:[%s2796_s5 + $0x240] sm:$0xff] %v1206_v13  ;;  %1461 = vst [vmem:[%s2796_s5 + $0x1c0] sm:$0xff] %v1790_v38  ;;  %v1342_v27 = vpop.f32.mrb[49].mxu1  ;;  %v1210_v40 = vadd.f32 %v1209_v42, %v2766_v21  ;;  %v1211_v43 = vpop.f32.mrb[51].mxu0 }
 0x1c1   : > { %1478 = vst [vmem:[%s2796_s5 + $0x248] sm:$0xff] %v1208_v44  ;;  %1455 = vst [vmem:[%s2796_s5 + $0x190] sm:$0xff] %v1342_v27  ;;  %v1791_v47 = vpop.f32.mrb[50].mxu1  ;;  %v1212_v30 = vadd.f32 %v1211_v43, %v2768_v10 }
 0x1c2   : > { %1480 = vst [vmem:[%s2796_s5 + $0x258] sm:$0xff] %v1210_v40  ;;  %1464 = vst [vmem:[%s2796_s5 + $0x1d8] sm:$0xff] %v1791_v47  ;;  %v1345_v8 = vpop.f32.mrb[51].mxu1 }
 0x1c3   : > { %1481 = vst [vmem:[%s2796_s5 + $0x260] sm:$0xff] %v1212_v30  ;;  %1458 = vst [vmem:[%s2796_s5 + $0x1a8] sm:$0xff] %v1345_v8 }
 0x1c5   : > { %v1215_v45 = vpop.f32.mrb[52].mxu0 }
 0x1c6   : > { %v1216_v21 = vadd.f32 %v1215_v45, %v2770_v15  ;;  %v1217_v49 = vpop.f32.mrb[53].mxu0 }
 0x1c7   : > { %v1794_v46 = vpop.f32.mrb[52].mxu1  ;;  %v1218_v56 = vadd.f32 %v1217_v49, %v2772_v26  ;;  %v1219_v50 = vpop.f32.mrb[54].mxu0 }
 0x1c8   : > { %1483 = vst [vmem:[%s2796_s5 + $0x270] sm:$0xff] %v1216_v21  ;;  %1473 = vst [vmem:[%s2796_s5 + $0x220] sm:$0xff] %v1794_v46  ;;  %v1358_v10 = vpop.f32.mrb[53].mxu1  ;;  %v1220_v53 = vadd.f32 %v1219_v50, %v2774_v39  ;;  %v1221_v62 = vpop.f32.mrb[55].mxu0 }
 0x1c9   : > { %1484 = vst [vmem:[%s2796_s5 + $0x278] sm:$0xff] %v1218_v56  ;;  %1467 = vst [vmem:[%s2796_s5 + $0x1f0] sm:$0xff] %v1358_v10  ;;  %v1795_v34 = vpop.f32.mrb[54].mxu1  ;;  %v1222_v15 = vadd.f32 %v1221_v62, %v2776_v58 }
 0x1ca   : > { %1486 = vst [vmem:[%s2796_s5 + $0x288] sm:$0xff] %v1220_v53  ;;  %1476 = vst [vmem:[%s2796_s5 + $0x238] sm:$0xff] %v1795_v34  ;;  %v1361_v2 = vpop.f32.mrb[55].mxu1 }
 0x1cb   : > { %1487 = vst [vmem:[%s2796_s5 + $0x290] sm:$0xff] %v1222_v15  ;;  %1470 = vst [vmem:[%s2796_s5 + $0x208] sm:$0xff] %v1361_v2 }
 0x1cd   : > { %v1225_v26 = vpop.f32.mrb[56].mxu0 }
 0x1ce   : > { %v1226_v39 = vadd.f32 %v1225_v26, %v2778_v61  ;;  %v1227_v41 = vpop.f32.mrb[57].mxu0 }
 0x1cf   : > { %v1798_v52 = vpop.f32.mrb[56].mxu1  ;;  %v1228_v55 = vadd.f32 %v1227_v41, %v2780_v60  ;;  %v1229_v14 = vpop.f32.mrb[58].mxu0 }
 0x1d0   : > { %1489 = vst [vmem:[%s2796_s5 + $0x2a0] sm:$0xff] %v1226_v39  ;;  %1485 = vst [vmem:[%s2796_s5 + $0x280] sm:$0xff] %v1798_v52  ;;  %v1374_v58 = vpop.f32.mrb[57].mxu1  ;;  %v1230_v3 = vadd.f32 %v1229_v14, %v2782_v23  ;;  %v1231_v19 = vpop.f32.mrb[59].mxu0 }
 0x1d1   : > { %1490 = vst [vmem:[%s2796_s5 + $0x2a8] sm:$0xff] %v1228_v55  ;;  %1479 = vst [vmem:[%s2796_s5 + $0x250] sm:$0xff] %v1374_v58  ;;  %v1799_v28 = vpop.f32.mrb[58].mxu1  ;;  %v1232_v61 = vadd.f32 %v1231_v19, %v2784_v24 }
 0x1d2   : > { %1492 = vst [vmem:[%s2796_s5 + $0x2b8] sm:$0xff] %v1230_v3  ;;  %1488 = vst [vmem:[%s2796_s5 + $0x298] sm:$0xff] %v1799_v28  ;;  %v1377_v1 = vpop.f32.mrb[59].mxu1 }
 0x1d3   : > { %1493 = vst [vmem:[%s2796_s5 + $0x2c0] sm:$0xff] %v1232_v61  ;;  %1482 = vst [vmem:[%s2796_s5 + $0x268] sm:$0xff] %v1377_v1 }
 0x1d5   : > { %v1235_v60 = vpop.f32.mrb[60].mxu0  ;;  %1508 = sbr.rel (!%p2187_p5) target bundleno = 505 (0x1f9), region = 44 }
 0x1d6   : > { %v1236_v23 = vadd.f32 %v1235_v60, %v2786_v25  ;;  %v1237_v54 = vpop.f32.mrb[61].mxu0 }
 0x1d7   : > { %v1802_v63 = vpop.f32.mrb[60].mxu1  ;;  %v1238_v9 = vadd.f32 %v1237_v54, %v2790_v29  ;;  %v1239_v24 = vpop.f32.mrb[62].mxu0 }
 0x1d8   : > { %1495 = vst [vmem:[%s2796_s5 + $0x2d0] sm:$0xff] %v1236_v23  ;;  %1497 = vst [vmem:[%s2796_s5 + $0x2e0] sm:$0xff] %v1802_v63  ;;  %v1390_v33 = vpop.f32.mrb[61].mxu1  ;;  %v1240_v31 = vadd.f32 %v1239_v24, %v2792_v32  ;;  %v1241_v0 = vpop.f32.mrb[63].mxu0 }
 0x1d9   : > { %1496 = vst [vmem:[%s2796_s5 + $0x2d8] sm:$0xff] %v1238_v9  ;;  %1491 = vst [vmem:[%s2796_s5 + $0x2b0] sm:$0xff] %v1390_v33  ;;  %v1803_v12 = vpop.f32.mrb[62].mxu1  ;;  %v1242_v37 = vadd.f32 %v1241_v0, %v2794_v7 }
 0x1da   : > { %1498 = vst [vmem:[%s2796_s5 + $0x2e8] sm:$0xff] %v1240_v31  ;;  %1500 = vst [vmem:[%s2796_s5 + $0x2f8] sm:$0xff] %v1803_v12  ;;  %v1393_v25 = vpop.f32.mrb[63].mxu1 }
 0x1db   : > { %1499 = vst [vmem:[%s2796_s5 + $0x2f0] sm:$0xff] %v1242_v37  ;;  %1494 = vst [vmem:[%s2796_s5 + $0x2c8] sm:$0xff] %v1393_v25 }
 0x1dc   : > { %s3002_s7 = smov (!%p1511_p10, %s1510_s7), 32 }
 0x1dd   : > { %s2933_s8 = smul.u32 384, %s3002_s7 }
 0x1df   : > { %s1516_s10 = ssub.s32 12288, %s2933_s8 }
 0x1e0   : > { %1517 = vsyncadd %s2928_s6, %s1516_s10  ;;  %p1684_p11 = scmp.ne.s32.totalorder %s2933_s8, 0  ;;  %s1907_s11 = smul.u32 12288, %s2170_s19 }
 0x1e1   : > { %s1523_s12 = sshll.u32 %s2796_s5, 4  ;;  %s2121_s20 = smov [#allocation5]   ;;  %s2945_s12 = int_to_ptr.vmem [resolvable:$true] %s1523_s12 }
 0x1e2   : > { %s2943_s14 = scalar_lea.hbm %s2993_s4, %s1907_s11  ;;  %s2051_s9 = scalar_lea.vmem %s2945_s12, %s2933_s8 }
 0x1e3   : > { %p2052_p5 = scmp.ne.s32.totalorder %s2945_s12, %s2051_s9  ;;  %s2055_s22 = sshll.u32 %s2121_s20, 4  ;;  %s2056_s22 = int_to_ptr.vmem [resolvable:$false] %s2055_s22 }
 0x1e4   : > { %s2057_s19 = scalar_lea.vmem %s2056_s22, 24576  ;;  %p2058_p0 = scmp.lt.s32.totalorder %s2945_s12, %s2056_s22 }
 0x1e5   : > { %p2053_p12 = pnand %p2052_p5, %p1684_p11  ;;  %p2059_p1 = scmp.lt.s32.totalorder %s2057_s19, %s2051_s9 }
 0x1e7   : > { %p2054_p13 = pneg %p2053_p12  ;;  %p2060_p2 = por %p2059_p1, %p2058_p0 }
 0x1e9   : > { %p2061_p3 = pnand %p2060_p2, %p2054_p13 }
 0x1eb   : > { %2064 = shalt.err (!%p2061_p3)
}
 0x1ec   : > { %s2065_s23 = scalar_lea.hbm %s2943_s14, %s2933_s8  ;;  %s2069_s29 = scalar_lea.hbm %s2993_s4, 48000 }
 0x1ed   : > { %p2066_p4 = scmp.ne.s32.totalorder %s2943_s14, %s2065_s23  ;;  %p2070_p9 = scmp.lt.u32.totalorder %s2943_s14, %s2993_s4 }
 0x1ee   : > { %p2071_p10 = scmp.lt.u32.totalorder %s2069_s29, %s2065_s23  ;;  %p2073_p12 = scmp.lt.u32.totalorder %s2065_s23, %s2943_s14 }
 0x1ef   : > { %p2067_p7 = pnand %p2066_p4, %p1684_p11 }
 0x1f0   : > { %p2072_p5 = por %p2071_p10, %p2070_p9 }
 0x1f1   : > { %p2068_p8 = pneg %p2067_p7 }
 0x1f2   : > { %p2074_p13 = por %p2073_p12, %p2072_p5 }
 0x1f4   : > { %p2075_p0 = pnand %p2074_p13, %p2068_p8 }
 0x1f6   : > { %2078 = shalt.err (!%p2075_p0)
}
 0x1f7   : > { %s2122_s7 = smov 384   ;;  %s2123_s10 = smov 24  }
 0x1f8   : > { %1529 = dma.vmem_to_hbm [thread:$0]  (%p1684_p11), %s2945_s12, %s2933_s8, %s2943_s14, %s2928_s6, %s2122_s7, %s2122_s7, %s2123_s10  }
 0x1f9 PF: > { %p1923_p1 = scmp.ge.s32.totalorder %s2117_s18, 2  ;;  %s1538_s11 = sand.u32 1, %s2105_s15  }
 0x1fa   : > { %s1539_s25 = scalar_lea.sflag [#allocation3], %s1538_s11 }
 0x1fb   : > { %p1918_p2 = pnand %p1923_p1, %p2191_p6 }
 0x1fd   : > { %2100 = dma.done.wait (!%p1918_p2), %s1539_s25, 12288  }
 0x1fe   : > { %2102 = vsyncadd (!%p1918_p2), %s1539_s25, 4294955008  ;;  %p15_p3 = scmp.ge.s32.totalorder %s2174_s21, 6   ;;  %s2997_s15 = smov %s2109_s16 }
 0x1ff   : > { %s2998_s16 = smov %s2113_s17  ;;  %s2999_s17 = smov %s2185_s24 }
 0x200   : > { %s3000_s18 = smov %s2174_s21  ;;  %17 = sbr.rel (!%p15_p3) target bundleno = 4 (0x4), region = 76 }
 0x207   :  { %1544 = vsyncpa [#allocation3], 1 }
 0x208   :  { %1546 = vsyncpa [#allocation3 + $0x1], 1 }
 0x209   :  { %1547 = vsyncpa [#allocation4], 1 }
 0x20a   :  { %1549 = vsyncpa [#allocation4 + $0x1], 1 }

</bundles_post_ra>
